<compile_context>
chip_gen: v6e
topology: v6e:2x2x1
jax: 0.10.0
libtpu: 0.0.40
codegen_flags: <defaults>
</compile_context>

<pallas_src>
import functools

import jax
import jax.numpy as jnp
from jax.experimental import pallas as pl
from jax.experimental.pallas import tpu as pltpu


# ----------------------------- kernel 1: gating -----------------------------
def gating_kernel(x_ref, histc_ref, persona_ref, w1x_ref, w1p_ref,
                  w2_ref, b2_ref, lng_ref, lnb_ref, wg_ref, bg_ref,
                  logits_ref):
    """Fusion-layer + gate logits for one (batch, seq-tile) block.

    Emits raw per-expert gate logits as a lane-dense (TS, E) block with a single
    full-block store; softmax / top-2 selection runs in XLA on the (B, S, E)
    result (removes the ~50 lane-width-1 VPU ops of the old in-kernel selection).
    """
    TS, D = x_ref.shape
    E = persona_ref.shape[0]
    b = pl.program_id(0)

    x = x_ref[...].astype(jnp.float32)                 # (TS, D)
    hist_c = histc_ref[pl.ds(b, 1), :]                 # (1, 128) = history@W1_h + b1 (hoisted)

    # layer-1: x contribution once per tile, persona contribution as ONE matmul
    shared = jnp.dot(x, w1x_ref[...], preferred_element_type=jnp.float32) + hist_c      # (TS,128)
    p_c = jnp.dot(persona_ref[...], w1p_ref[...], preferred_element_type=jnp.float32)   # (E,128)

    # per-expert ReLU activations stacked along sublanes -> one (E*TS,128) slab.
    # Broadcast add + leading-dim reshape (one VPU add, no concatenate copies).
    h1 = jnp.maximum(shared[None, :, :] + p_c[:, None, :], 0.0).reshape(E * TS, 128)

    # layer-2 + LayerNorm + gate reduce, batched across experts (one matmul/reduce)
    h2 = jnp.maximum(
        jnp.dot(h1, w2_ref[...], preferred_element_type=jnp.float32) + b2_ref[...], 0.0)  # (E*TS,D)
    mu = jnp.mean(h2, axis=-1, keepdims=True)
    var = jnp.mean((h2 - mu) ** 2, axis=-1, keepdims=True)
    ln = (h2 - mu) * jax.lax.rsqrt(var + 1e-5) * lng_ref[...] + lnb_ref[...]
    logit_col = jnp.sum(ln * wg_ref[...], axis=-1, keepdims=True) + bg_ref[...]           # (E*TS,1)

    # assemble a lane-dense (TS, E) block and store it once (single full-block store)
    lane = jax.lax.broadcasted_iota(jnp.int32, (TS, E), 1)
    out = jnp.zeros((TS, E), jnp.float32)
    for e in range(E):
        col = logit_col[e * TS:(e + 1) * TS, :]                         # (TS,1), static slice
        out = jnp.where(lane == e, jnp.broadcast_to(col, (TS, E)), out)
    logits_ref[...] = out


# ------------------------- kernel 2: expert mixture --------------------------
def moe_expert_kernel(flags_ref, x_ref, w_ref, wg_ref, wu_ref, wd_ref,
                      out_ref, acc_ref, *, weights_resident):
    """One (token-tile, expert) grid step of the MoE mixture.

    LoRA is pre-merged into per-expert effective bf16 weights, so each step is
    three well-filled matmuls: x@Wg_eff, x@Wu_eff (D->F) and h@Wd_eff (F->D).
    The mixture accumulates in an f32 VMEM scratch and is stored once per tile.
    Experts with no routed token in this tile (top-2 sparsity) are skipped via a
    scalar-prefetched flag.
    """
    i = pl.program_id(0)
    e = pl.program_id(1)
    n_e = pl.num_programs(1)
    widx = e if weights_resident else 0      # resident: index the (E,...) array in VMEM

    @pl.when(e == 0)
    def _():
        acc_ref[...] = jnp.zeros_like(acc_ref)

    @pl.when(flags_ref[i * n_e + e] != 0)    # skip experts with no routed tokens here
    def _():
        x = x_ref[...]                                                     # (TN, D) bf16
        g = jnp.dot(x, wg_ref[widx], preferred_element_type=jnp.float32)   # (TN, F)
        u = jnp.dot(x, wu_ref[widx], preferred_element_type=jnp.float32)   # (TN, F)
        h = (g * jax.nn.sigmoid(g)) * u                                    # SiLU(gate)*up, f32
        d = jnp.dot(h.astype(jnp.bfloat16), wd_ref[widx],
                    preferred_element_type=jnp.float32)                    # (TN, D)
        acc_ref[...] += w_ref[...] * d                                     # (TN,1) routing weight

    @pl.when(e == n_e - 1)
    def _():
        out_ref[...] = acc_ref[...].astype(out_ref.dtype)


# --------------------------------- wrapper -----------------------------------
_MIB = 1 << 20


def _pick_tile(n, target):
    """Largest multiple of 8 that divides n and is <= target; falls back to n
    itself (block == full dim also satisfies the Mosaic (8,128) block rule)."""
    if n <= target:
        return n
    t = (min(target, n) // 8) * 8
    while t >= 8:
        if n % t == 0:
            return t
        t -= 8
    return n


def _gating_vmem_bytes(TS, D, E, B):
    blocks = 2 * (TS * D * 4 + TS * E * 4)                   # x + logits (double buffered)
    weights = (B * 128 + E * D + 2 * D * 128 + 128 * D + 5 * D + 1) * 4
    live = (E * TS * 128 + 2 * E * TS * D + TS * 128) * 4    # h1/h2/ln slabs (rough)
    return blocks + 2 * weights + live


def _expert_vmem_bytes(TN, D, F, E, resident):
    wexp = E if resident else 1
    blocks = (2 * TN * D * 2                 # x (bf16, double buffered)
              + 2 * TN * 4                   # routing column
              + 2 * 2 * wexp * D * F * 2     # gate/up merged weights (bf16)
              + 2 * wexp * F * D * 2         # down merged weight (bf16)
              + 2 * TN * D * 4)              # output (f32)
    scratch = TN * D * 4                     # f32 mixture accumulator
    live = (2 * TN * F + 2 * TN * D) * 4     # g/u/h/d intermediates (rough)
    return blocks + scratch + live


def moe_block_forward(x, history, persona, params, *, seq_tile=256, token_tile=256):
    B, S, D = x.shape
    E = persona.shape[0]
    H = history.shape[-1]
    F = params["Wg"].shape[-1]
    N = B * S
    scale = params["lora_scale"]
    f32, bf16 = jnp.float32, jnp.bfloat16

    # --- tile selection: keep >=2 steps on the 'parallel' axes so both v7x TCs work ---
    ts_target = seq_tile
    if B == 1 and S >= 16:
        ts_target = min(seq_tile, max(8, S // 2))
    TS = _pick_tile(S, ts_target)
    SB = S // TS

    tn_target = token_tile
    if N >= 16:
        tn_target = min(token_tile, max(8, N // 2))
    TN = _pick_tile(N, tn_target)

    # per-expert merged weights stay VMEM-resident when small (v5e: DMA'd once, no
    # re-fetch per expert step); otherwise stream one expert's weights per step.
    resident = 3 * E * D * F * 2 <= 8 * _MIB
    # shrink the token tile until the expert working set fits a v7x-safe budget
    while _expert_vmem_bytes(TN, D, F, E, resident) > 40 * _MIB and TN > 8:
        nTN = _pick_tile(N, max(8, (TN // 2 // 8) * 8))
        if nTN >= TN:
            break
        TN = nTN
    NT = N // TN

    gating_vmem = int(min(56 * _MIB, max(32 * _MIB, 2 * _gating_vmem_bytes(TS, D, E, B))))
    expert_vmem = int(min(56 * _MIB, max(32 * _MIB,
                                         2 * _expert_vmem_bytes(TN, D, F, E, resident))))

    # ---------------- gating-weight prep (tiny, once per call) ----------------
    W1 = params["W1"].astype(f32)
    w1_x, w1_h, w1_p = W1[:D], W1[D:D + H], W1[D + H:]
    # history contribution hoisted to a (B,128) term (layer-1 bias folded in)
    hist_c = history.astype(f32) @ w1_h + params["b1"].astype(f32)           # (B, 128)

    full_g = lambda arr: pl.BlockSpec(arr.shape, lambda b, s, nd=arr.ndim: (0,) * nd)

    # ---- kernel 1: per-expert gate logits, lane-dense (B, S, E) output ----
    logits = pl.pallas_call(
        gating_kernel,
        out_shape=jax.ShapeDtypeStruct((B, S, E), jnp.float32),
        grid=(B, SB),
        in_specs=[
            pl.BlockSpec((None, TS, D), lambda b, s: (b, s, 0)),             # x (original dtype)
            full_g(hist_c), full_g(persona),
            full_g(w1_x), full_g(w1_p),
            full_g(params["W2"]), full_g(params["b2"]),
            full_g(params["ln_g"]), full_g(params["ln_b"]),
            full_g(params["wg"]), full_g(params["bg"]),
        ],
        out_specs=pl.BlockSpec((None, TS, E), lambda b, s: (b, s, 0)),
        compiler_params=pltpu.CompilerParams(
            dimension_semantics=("parallel", "parallel"),
            vmem_limit_bytes=gating_vmem),
    )(x, hist_c, persona.astype(f32), w1_x, w1_p,
      params["W2"], params["b2"], params["ln_g"], params["ln_b"],
      params["wg"], params["bg"])

    # ---- routing (softmax + top-2) on the tiny (N, E) logits: cheap XLA glue ----
    probs = jax.nn.softmax(logits, axis=-1)
    _, top_idx = jax.lax.top_k(probs, 2)           # ties -> lowest index, like torch.topk
    mask = jnp.sum(jax.nn.one_hot(top_idx, E, dtype=probs.dtype), axis=-2) > 0
    w_flat = jnp.where(mask, probs, 0.0).reshape(N, E)            # (N, E)
    weights = jnp.transpose(w_flat)[:, :, None]                   # (E, N, 1): per-expert column
    # per-(token-tile, expert) "any routed token" flags -> scalar prefetch (SMEM, 1-D)
    flags = (jnp.max(w_flat.reshape(NT, TN, E), axis=1) > 0).astype(jnp.int32).reshape(-1)

    # ---- expert weight prep: LoRA merged into effective bf16 weights ----
    Wg_eff = (params["Wg"][None]
              + scale * jnp.einsum("edr,erf->edf", params["Ag"], params["Bg"])).astype(bf16)
    Wu_eff = (params["Wu"][None]
              + scale * jnp.einsum("edr,erf->edf", params["Au"], params["Bu"])).astype(bf16)
    Wd_eff = (params["Wd"][None]
              + scale * jnp.einsum("efr,erd->efd", params["Ad"], params["Bd"])).astype(bf16)
    # TODO(synk): if E*D*F grows past what streaming per-expert blocks can hold on v7x
    # (64 MiB VMEM), tile the F axis with a third grid dim instead of merging.
    x_bf = x.reshape(N, D).astype(bf16)

    if resident:   # full (E,...) arrays, constant index map -> one DMA, index [e] in kernel
        w_spec = lambda shape: pl.BlockSpec((E,) + shape, lambda i, e, fl: (0, 0, 0))
    else:          # stream one expert's weights per step
        w_spec = lambda shape: pl.BlockSpec((1,) + shape, lambda i, e, fl: (e, 0, 0))

    grid_spec = pltpu.PrefetchScalarGridSpec(
        num_scalar_prefetch=1,
        grid=(NT, E),                       # token tiles parallel, experts innermost
        in_specs=[
            pl.BlockSpec((TN, D), lambda i, e, fl: (i, 0)),           # x (bf16)
            pl.BlockSpec((None, TN, 1), lambda i, e, fl: (e, i, 0)),  # routing weights column
            w_spec((D, F)), w_spec((D, F)), w_spec((F, D)),           # merged gate/up/down
        ],
        out_specs=pl.BlockSpec((TN, D), lambda i, e, fl: (i, 0)),
        scratch_shapes=[pltpu.VMEM((TN, D), jnp.float32)],            # mixture accumulator
    )
    out_flat = pl.pallas_call(
        functools.partial(moe_expert_kernel, weights_resident=resident),
        out_shape=jax.ShapeDtypeStruct((N, D), x.dtype),
        grid_spec=grid_spec,
        compiler_params=pltpu.CompilerParams(
            dimension_semantics=("parallel", "arbitrary"),
            vmem_limit_bytes=expert_vmem),
    )(flags, x_bf, weights, Wg_eff, Wu_eff, Wd_eff)

    return out_flat.reshape(B, S, D)


# ------------------------------ pure-JAX reference ---------------------------
def reference_forward(x, history, persona, p):
    """Faithful f32 reference of the PyTorch module (topk routing, LLaMA-MLP experts)."""
    B, S, D = x.shape
    E = persona.shape[0]
    H = history.shape[-1]
    hist_e = jnp.broadcast_to(history[:, None, :], (B, S, H))
    logits = []
    for i in range(E):
        pe = jnp.broadcast_to(persona[i][None, None, :], (B, S, D))
        gi = jnp.concatenate([x, hist_e, pe], axis=-1)
        h1 = jax.nn.relu(gi @ p["W1"] + p["b1"][0])
        h2 = jax.nn.relu(h1 @ p["W2"] + p["b2"][0])
        mu = h2.mean(-1, keepdims=True)
        var = ((h2 - mu) ** 2).mean(-1, keepdims=True)
        ln = (h2 - mu) / jnp.sqrt(var + 1e-5) * p["ln_g"][0] + p["ln_b"][0]
        logits.append(jnp.sum(ln * p["wg"][0], -1) + p["bg"][0, 0])
    gl = jnp.stack(logits, -1)
    probs = jax.nn.softmax(gl, -1)
    _, top_i = jax.lax.top_k(probs, 2)
    mask = jnp.sum(jax.nn.one_hot(top_i, E, dtype=probs.dtype), axis=-2) > 0
    w = jnp.where(mask, probs, 0.0)

    def lora_lin(inp, W, A, Bm):
        return inp @ W + p["lora_scale"] * ((inp @ A) @ Bm)

    out = jnp.zeros_like(x)
    for e in range(E):
        g = lora_lin(x, p["Wg"], p["Ag"][e], p["Bg"][e])
        u = lora_lin(x, p["Wu"], p["Au"][e], p["Bu"][e])
        h = jax.nn.silu(g) * u
        d = lora_lin(h, p["Wd"], p["Ad"][e], p["Bd"][e])
        out = out + w[..., e:e + 1] * d
    return out


# ----------------------------------- main ------------------------------------
if __name__ == "__main__":
    B, S = 2, 8            # batch, seq_len
    D = 32                 # input_dim / llm_dim
    H = 16                 # history_dim
    E = 4                  # num_experts
    F = 64                 # expert FFN intermediate dim
    R = 16                 # lora r
    LORA_ALPHA = 16.0

    key = jax.random.PRNGKey(0)
    ks = jax.random.split(key, 20)
    n = lambda k, shape, s: (s * jax.random.normal(k, shape)).astype(jnp.float32)

    params = dict(
        W1=n(ks[0], (2 * D + H, 128), 0.05),
        b1=n(ks[1], (1, 128), 0.05),
        W2=n(ks[2], (128, D), 0.05),
        b2=n(ks[3], (1, D), 0.05),
        ln_g=jnp.ones((1, D), jnp.float32),
        ln_b=jnp.zeros((1, D), jnp.float32),
        wg=n(ks[4], (1, D), 0.1),
        bg=jnp.zeros((1, 1), jnp.float32),
        # shared base FFN (original_ffn deep-copied into every expert => identical)
        Wg=n(ks[5], (D, F), 0.1),
        Wu=n(ks[6], (D, F), 0.1),
        Wd=n(ks[7], (F, D), 0.1),
        # per-expert LoRA factors (B random, not zero, so experts differ)
        Ag=n(ks[8], (E, D, R), 0.1), Bg=n(ks[9], (E, R, F), 0.1),
        Au=n(ks[10], (E, D, R), 0.1), Bu=n(ks[11], (E, R, F), 0.1),
        Ad=n(ks[12], (E, F, R), 0.1), Bd=n(ks[13], (E, R, D), 0.1),
        lora_scale=LORA_ALPHA / R,
    )

    x = jax.random.normal(ks[14], (B, S, D), jnp.float32)
    history = jax.random.normal(ks[15], (B, H), jnp.float32)
    persona = jax.random.normal(ks[16], (E, D), jnp.float32)

    out = jax.block_until_ready(moe_block_forward(x, history, persona, params))
    ref = reference_forward(x, history, persona, params)

    assert out.shape == (B, S, D) and out.dtype == jnp.float32
    err = float(jnp.max(jnp.abs(out - ref)))
    # Gating / selection is f32 in both paths (identical expert choice at these
    # shapes); expert FFN uses bf16 merged weights with f32 accumulation, so compare
    # against the f32 reference with a correspondingly loose tolerance.
    assert jnp.allclose(out, ref, rtol=5e-2, atol=1e-2), f"max abs diff {err}"

    print("KERNEL_OK")
</pallas_src>

<mosaic_0001>
module attributes {stable_mosaic.version = 11 : i64} {
  func.func @gating_kernel(%arg0: i32, %arg1: i32, %arg2: memref<1x8x32xf32, #tpu.memory_space<vmem>>, %arg3: memref<2x128xf32, #tpu.memory_space<vmem>>, %arg4: memref<4x32xf32, #tpu.memory_space<vmem>>, %arg5: memref<32x128xf32, #tpu.memory_space<vmem>>, %arg6: memref<32x128xf32, #tpu.memory_space<vmem>>, %arg7: memref<128x32xf32, #tpu.memory_space<vmem>>, %arg8: memref<1x32xf32, #tpu.memory_space<vmem>>, %arg9: memref<1x32xf32, #tpu.memory_space<vmem>>, %arg10: memref<1x32xf32, #tpu.memory_space<vmem>>, %arg11: memref<1x32xf32, #tpu.memory_space<vmem>>, %arg12: memref<1x1xf32, #tpu.memory_space<vmem>>, %arg13: memref<1x8x4xf32, #tpu.memory_space<vmem>>) attributes {dimension_semantics = [#tpu.dimension_semantics<parallel>, #tpu.dimension_semantics<parallel>], iteration_bounds = array<i64: 2, 1>, scalar_prefetch = 0 : i64, scratch_operands = 0 : i64, tpu.core_type = #tpu.core_type<tc>, window_params = [{transform_indices = @transform_0, window_bounds = array<i64: 1, 8, 32>}, {pipeline_mode = #tpu.pipeline_mode<synchronous>, transform_indices = @transform_1, window_bounds = array<i64: 2, 128>}, {pipeline_mode = #tpu.pipeline_mode<synchronous>, transform_indices = @transform_2, window_bounds = array<i64: 4, 32>}, {pipeline_mode = #tpu.pipeline_mode<synchronous>, transform_indices = @transform_3, window_bounds = array<i64: 32, 128>}, {pipeline_mode = #tpu.pipeline_mode<synchronous>, transform_indices = @transform_4, window_bounds = array<i64: 32, 128>}, {pipeline_mode = #tpu.pipeline_mode<synchronous>, transform_indices = @transform_5, window_bounds = array<i64: 128, 32>}, {pipeline_mode = #tpu.pipeline_mode<synchronous>, transform_indices = @transform_6, window_bounds = array<i64: 1, 32>}, {pipeline_mode = #tpu.pipeline_mode<synchronous>, transform_indices = @transform_7, window_bounds = array<i64: 1, 32>}, {pipeline_mode = #tpu.pipeline_mode<synchronous>, transform_indices = @transform_8, window_bounds = array<i64: 1, 32>}, {pipeline_mode = #tpu.pipeline_mode<synchronous>, transform_indices = @transform_9, window_bounds = array<i64: 1, 32>}, {pipeline_mode = #tpu.pipeline_mode<synchronous>, transform_indices = @transform_10, window_bounds = array<i64: 1, 1>}, {transform_indices = @transform_11, window_bounds = array<i64: 1, 8, 4>}]} {
    %c0 = arith.constant 0 : index
    %c0_0 = arith.constant 0 : index
    %c0_1 = arith.constant 0 : index
    %0 = vector.load %arg2[%c0, %c0_0, %c0_1] : memref<1x8x32xf32, #tpu.memory_space<vmem>>, vector<1x8x32xf32>
    %1 = vector.shape_cast %0 : vector<1x8x32xf32> to vector<8x32xf32>
    %2 = arith.index_cast %arg0 : i32 to index
    %c0_2 = arith.constant 0 : index
    %3 = vector.load %arg3[%2, %c0_2] : memref<2x128xf32, #tpu.memory_space<vmem>>, vector<1x128xf32>
    %c0_3 = arith.constant 0 : index
    %c0_4 = arith.constant 0 : index
    %4 = vector.load %arg5[%c0_3, %c0_4] : memref<32x128xf32, #tpu.memory_space<vmem>>, vector<32x128xf32>
    %cst = arith.constant dense<0.000000e+00> : vector<8x128xf32>
    %5 = tpu.matmul %1, %4, %cst {dimension_numbers = #tpu.dot_dimension_numbers<[1], [0], [0], [1], [0, 0, 1, 1], [], []>} : vector<8x32xf32>, vector<32x128xf32>, vector<8x128xf32> -> vector<8x128xf32>
    %6 = vector.broadcast %3 : vector<1x128xf32> to vector<8x128xf32>
    %7 = arith.addf %5, %6 : vector<8x128xf32>
    %c0_5 = arith.constant 0 : index
    %c0_6 = arith.constant 0 : index
    %8 = vector.load %arg4[%c0_5, %c0_6] : memref<4x32xf32, #tpu.memory_space<vmem>>, vector<4x32xf32>
    %c0_7 = arith.constant 0 : index
    %c0_8 = arith.constant 0 : index
    %9 = vector.load %arg6[%c0_7, %c0_8] : memref<32x128xf32, #tpu.memory_space<vmem>>, vector<32x128xf32>
    %cst_9 = arith.constant dense<0.000000e+00> : vector<4x128xf32>
    %10 = tpu.matmul %8, %9, %cst_9 {dimension_numbers = #tpu.dot_dimension_numbers<[1], [0], [0], [1], [0, 0, 1, 1], [], []>} : vector<4x32xf32>, vector<32x128xf32>, vector<4x128xf32> -> vector<4x128xf32>
    %11 = vector.shape_cast %7 : vector<8x128xf32> to vector<1x8x128xf32>
    %12 = vector.shape_cast %10 : vector<4x128xf32> to vector<4x1x128xf32>
    %13 = vector.broadcast %11 : vector<1x8x128xf32> to vector<4x8x128xf32>
    %14 = vector.broadcast %12 : vector<4x1x128xf32> to vector<4x8x128xf32>
    %15 = arith.addf %13, %14 : vector<4x8x128xf32>
    %cst_10 = arith.constant 0.000000e+00 : f32
    %16 = vector.broadcast %cst_10 : f32 to vector<4x8x128xf32>
    %17 = arith.maximumf %15, %16 : vector<4x8x128xf32>
    %18 = vector.shape_cast %17 : vector<4x8x128xf32> to vector<32x128xf32>
    %c0_11 = arith.constant 0 : index
    %c0_12 = arith.constant 0 : index
    %19 = vector.load %arg7[%c0_11, %c0_12] : memref<128x32xf32, #tpu.memory_space<vmem>>, vector<128x32xf32>
    %cst_13 = arith.constant dense<0.000000e+00> : vector<32x32xf32>
    %20 = tpu.matmul %18, %19, %cst_13 {dimension_numbers = #tpu.dot_dimension_numbers<[1], [0], [0], [1], [0, 0, 1, 1], [], []>} : vector<32x128xf32>, vector<128x32xf32>, vector<32x32xf32> -> vector<32x32xf32>
    %c0_14 = arith.constant 0 : index
    %c0_15 = arith.constant 0 : index
    %21 = vector.load %arg8[%c0_14, %c0_15] : memref<1x32xf32, #tpu.memory_space<vmem>>, vector<1x32xf32>
    %22 = vector.broadcast %21 : vector<1x32xf32> to vector<32x32xf32>
    %23 = arith.addf %20, %22 : vector<32x32xf32>
    %cst_16 = arith.constant 0.000000e+00 : f32
    %24 = vector.broadcast %cst_16 : f32 to vector<32x32xf32>
    %25 = arith.maximumf %23, %24 : vector<32x32xf32>
    %cst_17 = arith.constant dense<0.000000e+00> : vector<32xf32>
    %26 = vector.multi_reduction <add>, %25, %cst_17 [1] : vector<32x32xf32> to vector<32xf32>
    %27 = vector.shape_cast %26 : vector<32xf32> to vector<32x1xf32>
    %cst_18 = arith.constant 3.200000e+01 : f32
    %28 = vector.broadcast %cst_18 : f32 to vector<32x1xf32>
    %29 = arith.divf %27, %28 : vector<32x1xf32>
    %30 = vector.broadcast %29 : vector<32x1xf32> to vector<32x32xf32>
    %31 = arith.subf %25, %30 : vector<32x32xf32>
    %32 = arith.mulf %31, %31 : vector<32x32xf32>
    %cst_19 = arith.constant dense<0.000000e+00> : vector<32xf32>
    %33 = vector.multi_reduction <add>, %32, %cst_19 [1] : vector<32x32xf32> to vector<32xf32>
    %34 = vector.shape_cast %33 : vector<32xf32> to vector<32x1xf32>
    %cst_20 = arith.constant 3.200000e+01 : f32
    %35 = vector.broadcast %cst_20 : f32 to vector<32x1xf32>
    %36 = arith.divf %34, %35 : vector<32x1xf32>
    %37 = vector.broadcast %29 : vector<32x1xf32> to vector<32x32xf32>
    %38 = arith.subf %25, %37 : vector<32x32xf32>
    %cst_21 = arith.constant 9.99999974E-6 : f32
    %39 = vector.broadcast %cst_21 : f32 to vector<32x1xf32>
    %40 = arith.addf %36, %39 : vector<32x1xf32>
    %41 = math.rsqrt %40 : vector<32x1xf32>
    %42 = vector.broadcast %41 : vector<32x1xf32> to vector<32x32xf32>
    %43 = arith.mulf %38, %42 : vector<32x32xf32>
    %c0_22 = arith.constant 0 : index
    %c0_23 = arith.constant 0 : index
    %44 = vector.load %arg9[%c0_22, %c0_23] : memref<1x32xf32, #tpu.memory_space<vmem>>, vector<1x32xf32>
    %45 = vector.broadcast %44 : vector<1x32xf32> to vector<32x32xf32>
    %46 = arith.mulf %43, %45 : vector<32x32xf32>
    %c0_24 = arith.constant 0 : index
    %c0_25 = arith.constant 0 : index
    %47 = vector.load %arg10[%c0_24, %c0_25] : memref<1x32xf32, #tpu.memory_space<vmem>>, vector<1x32xf32>
    %48 = vector.broadcast %47 : vector<1x32xf32> to vector<32x32xf32>
    %49 = arith.addf %46, %48 : vector<32x32xf32>
    %c0_26 = arith.constant 0 : index
    %c0_27 = arith.constant 0 : index
    %50 = vector.load %arg11[%c0_26, %c0_27] : memref<1x32xf32, #tpu.memory_space<vmem>>, vector<1x32xf32>
    %51 = vector.broadcast %50 : vector<1x32xf32> to vector<32x32xf32>
    %52 = arith.mulf %49, %51 : vector<32x32xf32>
    %cst_28 = arith.constant dense<0.000000e+00> : vector<32xf32>
    %53 = vector.multi_reduction <add>, %52, %cst_28 [1] : vector<32x32xf32> to vector<32xf32>
    %54 = vector.shape_cast %53 : vector<32xf32> to vector<32x1xf32>
    %c0_29 = arith.constant 0 : index
    %c0_30 = arith.constant 0 : index
    %55 = vector.load %arg12[%c0_29, %c0_30] : memref<1x1xf32, #tpu.memory_space<vmem>>, vector<1x1xf32>
    %56 = vector.broadcast %55 : vector<1x1xf32> to vector<32x1xf32>
    %57 = arith.addf %54, %56 : vector<32x1xf32>
    %58 = tpu.iota {dimensions = array<i32: 1>} : vector<8x4xi32>
    %cst_31 = arith.constant 0.000000e+00 : f32
    %59 = vector.broadcast %cst_31 : f32 to vector<8x4xf32>
    %60 = vector.extract_strided_slice %57 {offsets = [0, 0], sizes = [8, 1], strides = [1, 1]} : vector<32x1xf32> to vector<8x1xf32>
    %c0_i32 = arith.constant 0 : i32
    %61 = vector.broadcast %c0_i32 : i32 to vector<8x4xi32>
    %62 = arith.cmpi eq, %58, %61 : vector<8x4xi32>
    %63 = vector.shape_cast %60 : vector<8x1xf32> to vector<8x1xf32>
    %64 = vector.broadcast %63 : vector<8x1xf32> to vector<8x4xf32>
    %65 = arith.select %62, %64, %59 : vector<8x4xi1>, vector<8x4xf32>
    %66 = vector.extract_strided_slice %57 {offsets = [8, 0], sizes = [8, 1], strides = [1, 1]} : vector<32x1xf32> to vector<8x1xf32>
    %c1_i32 = arith.constant 1 : i32
    %67 = vector.broadcast %c1_i32 : i32 to vector<8x4xi32>
    %68 = arith.cmpi eq, %58, %67 : vector<8x4xi32>
    %69 = vector.shape_cast %66 : vector<8x1xf32> to vector<8x1xf32>
    %70 = vector.broadcast %69 : vector<8x1xf32> to vector<8x4xf32>
    %71 = arith.select %68, %70, %65 : vector<8x4xi1>, vector<8x4xf32>
    %72 = vector.extract_strided_slice %57 {offsets = [16, 0], sizes = [8, 1], strides = [1, 1]} : vector<32x1xf32> to vector<8x1xf32>
    %c2_i32 = arith.constant 2 : i32
    %73 = vector.broadcast %c2_i32 : i32 to vector<8x4xi32>
    %74 = arith.cmpi eq, %58, %73 : vector<8x4xi32>
    %75 = vector.shape_cast %72 : vector<8x1xf32> to vector<8x1xf32>
    %76 = vector.broadcast %75 : vector<8x1xf32> to vector<8x4xf32>
    %77 = arith.select %74, %76, %71 : vector<8x4xi1>, vector<8x4xf32>
    %78 = vector.extract_strided_slice %57 {offsets = [24, 0], sizes = [8, 1], strides = [1, 1]} : vector<32x1xf32> to vector<8x1xf32>
    %c3_i32 = arith.constant 3 : i32
    %79 = vector.broadcast %c3_i32 : i32 to vector<8x4xi32>
    %80 = arith.cmpi eq, %58, %79 : vector<8x4xi32>
    %81 = vector.shape_cast %78 : vector<8x1xf32> to vector<8x1xf32>
    %82 = vector.broadcast %81 : vector<8x1xf32> to vector<8x4xf32>
    %83 = arith.select %80, %82, %77 : vector<8x4xi1>, vector<8x4xf32>
    %c0_32 = arith.constant 0 : index
    %c0_33 = arith.constant 0 : index
    %c0_34 = arith.constant 0 : index
    %84 = vector.load %arg13[%c0_32, %c0_33, %c0_34] : memref<1x8x4xf32, #tpu.memory_space<vmem>>, vector<1x8x4xf32>
    %85 = vector.shape_cast %84 : vector<1x8x4xf32> to vector<8x4xf32>
    %86 = vector.shape_cast %83 : vector<8x4xf32> to vector<1x8x4xf32>
    tpu.vector_store %arg13[%c0_32, %c0_33, %c0_34], %86 {strides = array<i32>} : memref<1x8x4xf32, #tpu.memory_space<vmem>>, vector<1x8x4xf32>,
    return
  }
  func.func @transform_0(%arg0: i32, %arg1: i32) -> (i32, i32, i32) {
    %c0_i32 = arith.constant 0 : i32
    %c0_i32_0 = arith.constant 0 : i32
    return %arg0, %arg1, %c0_i32 : i32, i32, i32
  }
  func.func @transform_1(%arg0: i32, %arg1: i32) -> (i32, i32) {
    %c0_i32 = arith.constant 0 : i32
    %c0_i32_0 = arith.constant 0 : i32
    %c0_i32_1 = arith.constant 0 : i32
    return %c0_i32, %c0_i32_0 : i32, i32
  }
  func.func @transform_2(%arg0: i32, %arg1: i32) -> (i32, i32) {
    %c0_i32 = arith.constant 0 : i32
    %c0_i32_0 = arith.constant 0 : i32
    %c0_i32_1 = arith.constant 0 : i32
    return %c0_i32, %c0_i32_0 : i32, i32
  }
  func.func @transform_3(%arg0: i32, %arg1: i32) -> (i32, i32) {
    %c0_i32 = arith.constant 0 : i32
    %c0_i32_0 = arith.constant 0 : i32
    %c0_i32_1 = arith.constant 0 : i32
    return %c0_i32, %c0_i32_0 : i32, i32
  }
  func.func @transform_4(%arg0: i32, %arg1: i32) -> (i32, i32) {
    %c0_i32 = arith.constant 0 : i32
    %c0_i32_0 = arith.constant 0 : i32
    %c0_i32_1 = arith.constant 0 : i32
    return %c0_i32, %c0_i32_0 : i32, i32
  }
  func.func @transform_5(%arg0: i32, %arg1: i32) -> (i32, i32) {
    %c0_i32 = arith.constant 0 : i32
    %c0_i32_0 = arith.constant 0 : i32
    %c0_i32_1 = arith.constant 0 : i32
    return %c0_i32, %c0_i32_0 : i32, i32
  }
  func.func @transform_6(%arg0: i32, %arg1: i32) -> (i32, i32) {
    %c0_i32 = arith.constant 0 : i32
    %c0_i32_0 = arith.constant 0 : i32
    %c0_i32_1 = arith.constant 0 : i32
    return %c0_i32, %c0_i32_0 : i32, i32
  }
  func.func @transform_7(%arg0: i32, %arg1: i32) -> (i32, i32) {
    %c0_i32 = arith.constant 0 : i32
    %c0_i32_0 = arith.constant 0 : i32
    %c0_i32_1 = arith.constant 0 : i32
    return %c0_i32, %c0_i32_0 : i32, i32
  }
  func.func @transform_8(%arg0: i32, %arg1: i32) -> (i32, i32) {
    %c0_i32 = arith.constant 0 : i32
    %c0_i32_0 = arith.constant 0 : i32
    %c0_i32_1 = arith.constant 0 : i32
    return %c0_i32, %c0_i32_0 : i32, i32
  }
  func.func @transform_9(%arg0: i32, %arg1: i32) -> (i32, i32) {
    %c0_i32 = arith.constant 0 : i32
    %c0_i32_0 = arith.constant 0 : i32
    %c0_i32_1 = arith.constant 0 : i32
    return %c0_i32, %c0_i32_0 : i32, i32
  }
  func.func @transform_10(%arg0: i32, %arg1: i32) -> (i32, i32) {
    %c0_i32 = arith.constant 0 : i32
    %c0_i32_0 = arith.constant 0 : i32
    %c0_i32_1 = arith.constant 0 : i32
    return %c0_i32, %c0_i32_0 : i32, i32
  }
  func.func @transform_11(%arg0: i32, %arg1: i32) -> (i32, i32, i32) {
    %c0_i32 = arith.constant 0 : i32
    %c0_i32_0 = arith.constant 0 : i32
    return %arg0, %arg1, %c0_i32 : i32, i32, i32
  }
}

</mosaic_0001>

<bundles_post_ra>
// kernel: tpu_custom_call.1
= control target key start
LH: loop header
LB: loop body
LE: loop exit
PB: predicated region body
PF: predicated region fallthrough
CT: control target
= control target key end

     0   :  { %s1195_s19 = smov 0   ;;  %s1197_s20 = smov 0   ;;  %s1348_s0 = inlined_call_operand.vmem [shape: f32[2,8,32], index: 0, kind: input, shape index: {}]   ;;  %s1349_s1 = inlined_call_operand.vmem [shape: f32[2,128], index: 1, kind: input, shape index: {}]   ;;  %s1350_s2 = inlined_call_operand.vmem [shape: f32[4,32], index: 2, kind: input, shape index: {}]   ;;  %s1351_s3 = inlined_call_operand.vmem [shape: f32[32,128], index: 3, kind: input, shape index: {}]   ;;  %s1352_s4 = inlined_call_operand.vmem [shape: f32[32,128], index: 4, kind: input, shape index: {}]   ;;  %s1353_s5 = inlined_call_operand.vmem [shape: f32[128,32], index: 5, kind: input, shape index: {}]   ;;  %s1354_s6 = inlined_call_operand.vmem [shape: f32[1,32], index: 6, kind: input, shape index: {}]   ;;  %s1355_s7 = inlined_call_operand.vmem [shape: f32[1,32], index: 7, kind: input, shape index: {}]   ;;  %s1356_s8 = inlined_call_operand.vmem [shape: f32[1,32], index: 8, kind: input, shape index: {}]   ;;  %s1357_s9 = inlined_call_operand.vmem [shape: f32[1,32], index: 9, kind: input, shape index: {}]   ;;  %s1358_s10 = inlined_call_operand.<no memory space> [shape: f32[1,1], index: 10, kind: input, shape index: {}]   ;;  %s1359_s11 = inlined_call_operand.vmem [shape: f32[2,8,4], index: 11, kind: output, shape index: {}]  }
   0x1   :  { %v16_v0 = vstv %s1358_s10  ;;  %s1199_s21 = smov 0  }
   0x2   :  { %17 = vst [vmem:[#allocation2] sm:$0x1] %v16_v0 }
   0x3 LB: > { %s35_s10 = sadd.s32 1, %s1122_s20  ;;  %p963_p0 = scmp.ge.s32.totalorder %s1126_s21, 1  ;;  %s1126_s21 = sphi %s1199_s21, %s23_s21   ;;  %s1122_s20 = sphi %s1197_s20, %s1361_s20   ;;  %s1118_s19 = sphi %s1195_s19, %s1360_s19  }
   0x4   : > { %p37_p1 = scmp.ge.s32.totalorder %s35_s10, 2  ;;  %p357_p2 = scmp.lt.s32.totalorder %s1126_s21, 3 }
   0x6   : > { %s1363_s10 = smov (%p37_p1, %s35_s10), 0  ;;  %p358_p3 = pnand %p963_p0, %p357_p2 }
   0x7   : > { %p401_p4 = scmp.lt.s32.totalorder (!%p358_p3), %s1118_s19, 1  ;;  %s416_s18 = scalar_lea.vmem (!%p358_p3), %s1349_s1, %s1118_s19 }
   0x8   : > { %361 = sbr.rel (%p358_p3) target bundleno = 1024 (0x400), region = 64 }
   0xd   : > { %v421_v1 = vld [vmem:[%s1351_s3 + $0x18] sm:$0xff]  ;;  %v1128_v2 = vmov 0.0   ;;  %v420_v3 = vld [vmem:[%s1351_s3 + $0x10] sm:$0xff]  ;;  %vm1129_vm0 = vmmov 0   ;;  %s1224_s26 = scalar_select %p401_p4, %s1118_s19, 1  ;;  %v419_v4 = vld [vmem:[%s1351_s3 + $0x8] sm:$0xff]  ;;  %v582_v30 = vlaneseq }
   0xe   : > { %1006 = vmatprep.subr.mxu1 %v1128_v2  ;;  %1014 = vmatprep.mubr.msk.f32.mxu1 %vm1129_vm0, %v1128_v2  ;;  %v646_v5 = vld [vmem:[%s1353_s5 + $0x78] sm:$0xff]  ;;  %v645_v6 = vld [vmem:[%s1353_s5 + $0x70] sm:$0xff]  ;;  %v418_v7 = vld [vmem:[%s1351_s3] sm:$0xff]  ;;  %vm426_vm1 = vcmask 261120   ;;  %v1130_v28 = vmov 1966171168  }
   0xf   : > { %1007 = vmatpush3.msra.mxu1 %v421_v1  ;;  %s964_s14 = sshll.u32 %s1224_s26, 3  ;;  %1028 = vmatprep.subr.mxu0 %v646_v5  ;;  %v644_v8 = vld [vmem:[%s1353_s5 + $0x68] sm:$0xff]  ;;  %v504_v10 = vld [vmem:[%s1352_s4 + $0x18] sm:$0xff]  ;;  %v503_v11 = vld [vmem:[%s1352_s4 + $0x10] sm:$0xff]  ;;  %v580_v29 = vunpack.c.l.s4 %v1130_v28  ;;  %v583_v33 = vshrl.u32 %v582_v30, 7  ;;  %vm882_vm6 = vcmask 31744  }
  0x10   : > { %1008 = vmatprep.subr.mxu1 %v1128_v2  ;;  %s407_s22 = scalar_lea.vmem %s1348_s0, %s964_s14  ;;  %1029 = vmatpush3.msra.mxu0 %v646_v5  ;;  %v643_v12 = vld [vmem:[%s1353_s5 + $0x60] sm:$0xff]  ;;  %v502_v13 = vld [vmem:[%s1352_s4 + $0x8] sm:$0xff]  ;;  %v642_v14 = vld [vmem:[%s1353_s5 + $0x58] sm:$0xff]  ;;  %s414_s13 = scalar_lea.vmem %s1359_s11, %s964_s14 }
  0x11   : > { %1009 = vmatpush3.msra.mxu1 %v420_v3  ;;  %v415_v9 = vld [vmem:[%s407_s22] sm:$0xff]  ;;  %1030 = vmatprep.subr.mxu0 %v645_v6  ;;  %v641_v16 = vld [vmem:[%s1353_s5 + $0x50] sm:$0xff]  ;;  %v640_v18 = vld [vmem:[%s1353_s5 + $0x48] sm:$0xff]  ;;  %v581_v32 = vunpack.c.0.s8 %v580_v29  ;;  %v605_v38 = vsub.s32 0, %v583_v33 }
  0x12   : > { %1010 = vmatprep.subr.mxu1 %v1128_v2  ;;  %1031 = vmatpush3.msra.mxu0 %v645_v6  ;;  %v501_v15 = vld [vmem:[%s1352_s4] sm:$0xff]  ;;  %v638_v20 = vld [vmem:[%s1353_s5 + $0x38] sm:$0xff]  ;;  %v637_v21 = vld [vmem:[%s1353_s5 + $0x30] sm:$0xff] }
  0x13   : > { %1011 = vmatpush3.msra.mxu1 %v419_v4  ;;  %1032 = vmatprep.subr.mxu0 %v644_v8  ;;  %v500_v17 = vld [vmem:[%s1350_s2] sm:$0xf]  ;;  %v636_v22 = vld [vmem:[%s1353_s5 + $0x28] sm:$0xff]  ;;  %v634_v24 = vld [vmem:[%s1353_s5 + $0x18] sm:$0xff]  ;;  %v584_v35 = vsub.s32 %v581_v32, %v583_v33 }
  0x14   : > { %1012 = vmatprep.subr.mxu1 %v1128_v2  ;;  %1033 = vmatpush3.msra.mxu0 %v644_v8  ;;  %v639_v19 = vld [vmem:[%s1353_s5 + $0x40] sm:$0xff]  ;;  %v633_v25 = vld [vmem:[%s1353_s5 + $0x10] sm:$0xff]  ;;  %v632_v26 = vld [vmem:[%s1353_s5 + $0x8] sm:$0xff] }
  0x15   : > { %1013 = vmatpush3.msra.mxu1 %v418_v7  ;;  %1034 = vmatprep.subr.mxu0 %v643_v12  ;;  %v635_v23 = vld [vmem:[%s1353_s5 + $0x20] sm:$0xff] }
  0x16   : > { %1015 = vmatmul.mubr.msk.f32.vlgmr.msra.gmra.mxu1 %vm426_vm1, %v415_v9  ;;  %1017 = vmatprep.subr.mxu1 %v1128_v2  ;;  %v631_v27 = vld [vmem:[%s1353_s5] sm:$0xff] }
  0x17   : > { %1018 = vmatpush3.msra.mxu1 %v504_v10  ;;  %1025 = vmatprep.mubr.msk.f32.mxu1 %vm1129_vm0, %v1128_v2  ;;  %v966_v39 = vld [vmem:[%s416_s18] ss:$0 sm:$0xff] }
  0x18   : > { %1019 = vmatprep.subr.mxu1 %v1128_v2  ;;  %1035 = vmatpush3.msra.mxu0 %v643_v12  ;;  %v969_v60 = vld [vmem:[%s1354_s6] ss:$0 sm:$0xff] }
  0x19   : > { %1020 = vmatpush3.msra.mxu1 %v503_v11  ;;  %1036 = vmatprep.subr.mxu0 %v642_v14 }
  0x1a   : > { %1021 = vmatprep.subr.mxu1 %v1128_v2  ;;  %1037 = vmatpush3.msra.mxu0 %v642_v14 }
  0x1b   : > { %1022 = vmatpush3.msra.mxu1 %v502_v13  ;;  %1038 = vmatprep.subr.mxu0 %v641_v16 }
  0x1c   : > { %1023 = vmatprep.subr.mxu1 %v1128_v2  ;;  %1039 = vmatpush3.msra.mxu0 %v641_v16 }
  0x1d   : > { %1024 = vmatpush3.msra.mxu1 %v501_v15  ;;  %1040 = vmatprep.subr.mxu0 %v640_v18 }
  0x1e   : > { %1026 = vmatmul.mubr.msk.f32.vlgmr.msra.gmra.mxu1 %vm426_vm1, %v500_v17  ;;  %1041 = vmatpush3.msra.mxu0 %v640_v18 }
  0x1f   : > { %1042 = vmatprep.subr.mxu0 %v639_v19 }
  0x20   : > { %1043 = vmatpush3.msra.mxu0 %v639_v19 }
  0x21   : > { %1044 = vmatprep.subr.mxu0 %v638_v20 }
  0x22   : > { %1045 = vmatpush3.msra.mxu0 %v638_v20 }
  0x23   : > { %1046 = vmatprep.subr.mxu0 %v637_v21 }
  0x24   : > { %1047 = vmatpush3.msra.mxu0 %v637_v21 }
  0x25   : > { %1048 = vmatprep.subr.mxu0 %v636_v22 }
  0x26   : > { %1049 = vmatpush3.msra.mxu0 %v636_v22 }
  0x27   : > { %1050 = vmatprep.subr.mxu0 %v635_v23 }
  0x28   : > { %1051 = vmatpush3.msra.mxu0 %v635_v23 }
  0x29   : > { %1052 = vmatprep.subr.mxu0 %v634_v24 }
  0x2a   : > { %1053 = vmatpush3.msra.mxu0 %v634_v24 }
  0x2b   : > { %1054 = vmatprep.subr.mxu0 %v633_v25 }
  0x2c   : > { %1055 = vmatpush3.msra.mxu0 %v633_v25 }
  0x2d   : > { %1056 = vmatprep.subr.mxu0 %v632_v26 }
  0x2e   : > { %1057 = vmatpush3.msra.mxu0 %v632_v26 }
  0x2f   : > { %1058 = vmatprep.subr.mxu0 %v631_v27 }
  0x30   : > { %1059 = vmatpush3.msra.mxu0 %v631_v27 }
  0xd6   : > { %v496_v31 = vpop.f32.mrf.mxu1 }
  0xd7   : > { %v497_v43 = vadd.f32 %v966_v39, %v496_v31 }
  0xd8   : > { %v1016_v34 = vpop.f32.mrf.mxu1 }
  0xde   : > { %v574_v36 = vpop.f32.mrf.mxu1 }
  0xdf   : > { %v585_v37 = vrot.slane %v574_v36, %v584_v35 }
  0xe0   : > { %v1027_v40 = vpop.f32.mrf.mxu1 }
  0xe1   : > { %v586_v41 = vcombine.high %v585_v37, %v585_v37  ;;  %v593_v42 = vrot.slane %v585_v37, %v584_v35 }
  0xe3   : > { %v600_v44 = vrot.slane %v586_v41, %v584_v35  ;;  %v601_v45 = vcombine.high %v593_v42, %v593_v42  ;;  %v606_v46 = vrot.slane %v593_v42, %v605_v38 }
  0xe5   : > { %v602_v47 = vcombine.high %v600_v44, %v600_v44  ;;  %v623_v48 = vadd.f32 %v606_v46, %v497_v43  ;;  %v610_v49 = vrot.slane %v600_v44, %v605_v38  ;;  %v614_v50 = vrot.slane %v601_v45, %v605_v38  ;;  %v970_v46 = vld [vmem:[%s1355_s7] ss:$0 sm:$0xff] }
  0xe7   : > { %v627_v51 = vmax.f32 %v623_v48, 0.0  ;;  %v624_v52 = vadd.f32 %v610_v49, %v497_v43  ;;  %v625_v53 = vadd.f32 %v614_v50, %v497_v43  ;;  %v618_v54 = vrot.slane %v602_v47, %v605_v38  ;;  %v971_v48 = vld [vmem:[%s1356_s8] ss:$0 sm:$0xff] }
  0xe9   : > { %1060 = vmatprep.mubr.f32.mxu0 %v627_v51  ;;  %v628_v55 = vmax.f32 %v624_v52, 0.0  ;;  %v629_v56 = vmax.f32 %v625_v53, 0.0  ;;  %v626_v57 = vadd.f32 %v618_v54, %v497_v43  ;;  %v972_v51 = vld [vmem:[%s1357_s9] ss:$0 sm:$0xff] }
  0xeb   : > { %1061 = vmatmul.mubr.f32.vlgmr.msra.gmra.mxu0 %v628_v55  ;;  %v630_v58 = vmax.f32 %v626_v57, 0.0 }
  0xec   : > { %1063 = vmatprep.mubr.f32.mxu0 %v629_v56 }
  0xef   : > { %1064 = vmatmul.mubr.f32.gmra.mxu0 %v630_v58 }
 0x1ab   : > { %v1062_v59 = vpop.f32.mrf.mxu0 }
 0x1ac   : > { %v726_v62 = vadd.f32 %v1062_v59, %v969_v60 }
 0x1ad   : > { %v720_v61 = vpop.f32.mrf.mxu0 }
 0x1ae   : > { %v721_v63 = vadd.f32 %v969_v60, %v720_v61  ;;  %v740_v3 = vmax.f32 %v726_v62, 0.0 }
 0x1af   : > { %v1065_v0 = vpop.f32.mrf.mxu0 }
 0x1b0   : > { %v739_v1 = vmax.f32 %v721_v63, 0.0  ;;  %v736_v4 = vadd.f32 %v1065_v0, %v969_v60  ;;  %v746_v9 = vsel %vm426_vm1, %v740_v3, 0.0 }
 0x1b1   : > { %v730_v2 = vpop.f32.mrf.mxu0 }
 0x1b2   : > { %v731_v5 = vadd.f32 %v969_v60, %v730_v2  ;;  %v743_v6 = vsel %vm426_vm1, %v739_v1, 0.0  ;;  %v742_v8 = vmax.f32 %v736_v4, 0.0 }
 0x1b3   : > { %744 = vadd.xlane.f32.xlu0 %v743_v6 }
 0x1b4   : > { %v741_v7 = vmax.f32 %v731_v5, 0.0  ;;  %v752_v11 = vsel %vm426_vm1, %v742_v8, 0.0 }
 0x1b6   : > { %v749_v10 = vsel %vm426_vm1, %v741_v7, 0.0 }
 0x1b7   : > { %747 = vadd.xlane.f32.xlu0 %v746_v9  ;;  %750 = vadd.xlane.f32.xlu1 %v749_v10  ;;  %v973_v9 = vld [vmem:[#allocation2] ss:$0 sm:$0xff] }
 0x1bb   : > { %753 = vadd.xlane.f32.xlu1 %v752_v11 }
 0x23c   : > { %v745_v12 = vpop.xlane.xlu0 %744 }
 0x23d   : > { %v756_v13 = vmul.f32 0.03125, %v745_v12 }
 0x23f   : > { %v760_v14 = vsub.f32 %v739_v1, %v756_v13 }
 0x240   : > { %v748_v15 = vpop.xlane.xlu0 %747  ;;  %v751_v16 = vpop.xlane.xlu1 %750 }
 0x241   : > { %v757_v17 = vmul.f32 0.03125, %v748_v15  ;;  %v758_v18 = vmul.f32 0.03125, %v751_v16  ;;  %v764_v19 = vmul.f32 %v760_v14, %v760_v14 }
 0x243   : > { %v761_v20 = vsub.f32 %v740_v3, %v757_v17  ;;  %v762_v21 = vsub.f32 %v741_v7, %v758_v18  ;;  %v768_v22 = vsel %vm426_vm1, %v764_v19, 0.0  ;;  %v853_v18 = vand.u32 127, %v582_v30 }
 0x244   : > { %769 = vadd.xlane.f32.xlu0 %v768_v22  ;;  %v754_v23 = vpop.xlane.xlu1 %753 }
 0x245   : > { %v759_v24 = vmul.f32 0.03125, %v754_v23  ;;  %v765_v25 = vmul.f32 %v761_v20, %v761_v20  ;;  %v766_v26 = vmul.f32 %v762_v21, %v762_v21  ;;  %vm854_vm2 = vcmp.eq.s32.totalorder %v853_v18, 0 }
 0x246   : > { %vm861_vm3 = vcmp.eq.s32.totalorder %v853_v18, 1  ;;  %vm868_vm4 = vcmp.eq.s32.totalorder %v853_v18, 2  ;;  %vm875_vm5 = vcmp.eq.s32.totalorder %v853_v18, 3 }
 0x247   : > { %v763_v27 = vsub.f32 %v742_v8, %v759_v24  ;;  %v771_v28 = vsel %vm426_vm1, %v765_v25, 0.0  ;;  %v774_v29 = vsel %vm426_vm1, %v766_v26, 0.0  ;;  %v1131_v8 = vmov 0  }
 0x248   : > { %772 = vadd.xlane.f32.xlu1 %v771_v28  ;;  %775 = vadd.xlane.f32.xlu0 %v774_v29 }
 0x249   : > { %v767_v31 = vmul.f32 %v763_v27, %v763_v27  ;;  %1094 = vset.pattern.permute.xlu0 %v1131_v8  ;;  %1095 = vset.pattern.permute.xlu1 %v1131_v8 }
 0x24b   : > { %v777_v32 = vsel %vm426_vm1, %v767_v31, 0.0 }
 0x24c   : > { %778 = vadd.xlane.f32.xlu1 %v777_v32 }
 0x2cd   : > { %v770_v33 = vpop.xlane.xlu0 %769 }
 0x2ce   : > { %v780_v34 = vmul.f32 0.03125, %v770_v33 }
 0x2d0   : > { %v784_v35 = vadd.f32 1e-05, %v780_v34 }
 0x2d1   : > { %v776_v36 = vpop.xlane.xlu0 %775  ;;  %v773_v37 = vpop.xlane.xlu1 %772 }
 0x2d2   : > { %1096 = vrsqrt.f32 %v784_v35  ;;  %v782_v38 = vmul.f32 0.03125, %v776_v36  ;;  %v781_v39 = vmul.f32 0.03125, %v773_v37 }
 0x2d4   : > { %v786_v40 = vadd.f32 1e-05, %v782_v38  ;;  %v785_v41 = vadd.f32 1e-05, %v781_v39 }
 0x2d5   : > { %v779_v42 = vpop.xlane.xlu1 %778 }
 0x2d6   : > { %1098 = vrsqrt.f32 %v786_v40  ;;  %v783_v43 = vmul.f32 0.03125, %v779_v42 }
 0x2d7   : > { %1100 = vrsqrt.f32 %v785_v41 }
 0x2d8   : > { %v787_v44 = vadd.f32 1e-05, %v783_v43 }
 0x2da   : > { %1102 = vrsqrt.f32 %v787_v44 }
 0x2df   : > { %v1097_v45 = vpop.eup %1096 }
 0x2e0   : > { %v792_v47 = vmul.f32 %v1097_v45, %v760_v14 }
 0x2e2   : > { %v803_v49 = vmul.f32 %v970_v46, %v792_v47 }
 0x2e3   : > { %v1099_v50 = vpop.eup %1098 }
 0x2e4   : > { %v1101_v52 = vpop.eup %1100  ;;  %v814_v53 = vadd.f32 %v971_v48, %v803_v49  ;;  %v794_v54 = vmul.f32 %v1099_v50, %v762_v21 }
 0x2e5   : > { %v793_v55 = vmul.f32 %v1101_v52, %v761_v20 }
 0x2e6   : > { %v825_v56 = vmul.f32 %v972_v51, %v814_v53  ;;  %v805_v57 = vmul.f32 %v970_v46, %v794_v54 }
 0x2e7   : > { %v1103_v58 = vpop.eup %1102  ;;  %v804_v59 = vmul.f32 %v970_v46, %v793_v55 }
 0x2e8   : > { %v829_v60 = vsel %vm426_vm1, %v825_v56, 0.0  ;;  %v816_v61 = vadd.f32 %v971_v48, %v805_v57  ;;  %v795_v62 = vmul.f32 %v1103_v58, %v763_v27 }
 0x2e9   : > { %830 = vadd.xlane.f32.xlu0 %v829_v60  ;;  %v815_v63 = vadd.f32 %v971_v48, %v804_v59 }
 0x2ea   : > { %v827_v0 = vmul.f32 %v972_v51, %v816_v61  ;;  %v806_v1 = vmul.f32 %v970_v46, %v795_v62 }
 0x2eb   : > { %v826_v2 = vmul.f32 %v972_v51, %v815_v63 }
 0x2ec   : > { %v835_v3 = vsel %vm426_vm1, %v827_v0, 0.0  ;;  %v817_v4 = vadd.f32 %v971_v48, %v806_v1 }
 0x2ed   : > { %836 = vadd.xlane.f32.xlu0 %v835_v3  ;;  %v832_v5 = vsel %vm426_vm1, %v826_v2, 0.0 }
 0x2ee   : > { %833 = vadd.xlane.f32.xlu1 %v832_v5  ;;  %v828_v6 = vmul.f32 %v972_v51, %v817_v4 }
 0x2f0   : > { %v838_v7 = vsel %vm426_vm1, %v828_v6, 0.0 }
 0x2f2   : > { %839 = vadd.xlane.f32.xlu1 %v838_v7 }
 0x372   : > { %v831_v10 = vpop.xlane.xlu0 %830 }
 0x373   : > { %v848_v11 = vadd.f32 %v973_v9, %v831_v10 }
 0x375   : > { %857 = vperm.xlu0 %1094, %v848_v11  }
 0x376   : > { %v837_v14 = vpop.xlane.xlu0 %836 }
 0x377   : > { %v834_v12 = vpop.xlane.xlu1 %833  ;;  %v850_v15 = vadd.f32 %v973_v9, %v837_v14 }
 0x378   : > { %v849_v13 = vadd.f32 %v973_v9, %v834_v12 }
 0x37a   : > { %864 = vperm.xlu1 %1095, %v849_v13  }
 0x37b   : > { %v840_v16 = vpop.xlane.xlu1 %839 }
 0x37c   : > { %v851_v17 = vadd.f32 %v973_v9, %v840_v16 }
 0x37e   : > { %871 = vperm.xlu1 %1095, %v850_v15  }
 0x382   : > { %878 = vperm.xlu1 %1095, %v851_v17  }
 0x3f0   : > { %v858_v20 = vpop.permute.xlu0 %857 }
 0x3f1   : > { %v860_v22 = vsel %vm854_vm2, %v858_v20, 0.0 }
 0x3f5   : > { %v865_v19 = vpop.permute.xlu1 %864 }
 0x3f6   : > { %v867_v23 = vsel %vm861_vm3, %v865_v19, %v860_v22 }
 0x3f9   : > { %v872_v21 = vpop.permute.xlu1 %871 }
 0x3fa   : > { %v874_v24 = vsel %vm868_vm4, %v872_v21, %v867_v23 }
 0x3fd   : > { %v879_v25 = vpop.permute.xlu1 %878 }
 0x3fe   : > { %v881_v26 = vsel %vm875_vm5, %v879_v25, %v874_v24 }
 0x3ff   : > { %883 = vst.msk [vmem:[%s414_s13] sm:$0xff] %vm882_vm6, %v881_v26 }
 0x400 PF: > { %s23_s21 = sadd.s32 1, %s1126_s21   ;;  %s1360_s19 = smov %s1122_s20 }
 0x401   : > { %p20_p5 = scmp.ge.s32.totalorder %s23_s21, 4   ;;  %s1361_s20 = smov %s1363_s10 }
 0x403   :  { %22 = sbr.rel (!%p20_p5) target bundleno = 3 (0x3), region = 95 }

</bundles_post_ra>
